<compile_context>
chip_gen: v7x
topology: tpu7x:2x2x1
jax: 0.10.0
libtpu: 0.0.40
codegen_flags: <defaults>
</compile_context>

<pallas_src>
import math

import jax
import jax.numpy as jnp
from jax import lax
from jax.experimental import pallas as pl
from jax.experimental.pallas import tpu as pltpu

H_PAD = 128      # hidden dim padded to MXU/lane width (real H = 2*vector_dim = 32)
OUT_PAD = 128    # classifier output padded lane-dense; real logits are columns [:2]
B_TILE_CAP = 256 # max batch rows per tile (keeps xp scratch ~8 MiB at tt=64 -> v7x safe)


def _round_up(x, m):
    return ((x + m - 1) // m) * m


def _make_kernel(tt, t_total, n_t, unroll):
    """Build the per-(batch-tile, time-tile) kernel. tt / t_total / n_t are static ints."""
    needs_time_mask = (n_t * tt != t_total)   # only the last time tile can be partial

    def kernel(emb_ref, w_ih_ref, w_hh_ref, bias_ref, w_fc_ref, b_fc_ref,
               out_ref, h_ref, xp_ref):
        # emb_ref : [tt, B_TILE, D]      bf16  time-major embedded tokens (streamed)
        # w_ih_ref: [D, H_PAD]           bf16  input->hidden weight (pre-transposed, zero-padded)
        # w_hh_ref: [H_PAD, H_PAD]       bf16  hidden->hidden weight (pre-transposed, zero-padded)
        # bias_ref: [1, H_PAD]           f32   b_ih + b_hh (zero-padded)
        # w_fc_ref: [H_PAD, OUT_PAD]     f32   classifier weight (pre-transposed, zero-padded)
        # b_fc_ref: [1, OUT_PAD]         f32
        # out_ref : [B_TILE, OUT_PAD]    f32   written only on the last time tile
        # h_ref   : [B_TILE, H_PAD]      f32   scratch: hidden-state carry across time tiles
        # xp_ref  : [tt, B_TILE, H_PAD]  f32   scratch: per-tile hoisted input projection
        t = pl.program_id(1)
        t_tile, b_tile, d = emb_ref.shape
        h_pad = w_hh_ref.shape[0]

        @pl.when(t == 0)
        def _():
            h_ref[...] = jnp.zeros_like(h_ref)

        # --- Hoisted input projection: one MXU matmul per time tile, bias folded in. ---
        x = emb_ref[...].reshape(t_tile * b_tile, d)                     # bf16
        x_proj = jnp.dot(x, w_ih_ref[...], preferred_element_type=jnp.float32)
        x_proj = x_proj + bias_ref[...]                                   # one add per tile
        xp_ref[...] = x_proj.reshape(t_tile, b_tile, h_pad)

        # Constant RHS loaded once outside the unrolled loop so Mosaic can keep it
        # resident in the MXU weight registers across the unrolled steps.
        # TODO(synk): drive the MXU explicitly (matmul_push_rhs / acc_lhs / pop) only if a
        # bundle dump shows W_hh being re-pushed every unrolled step.
        w_hh = w_hh_ref[...]                                              # bf16 [H_PAD, H_PAD]

        if needs_time_mask:
            steps_valid = jnp.minimum(tt, t_total - t * tt)

        # --- Serial recurrence: only h @ W_hh (bf16 operands, f32 acc) + tanh on the path. ---
        def step(s, h):
            z = xp_ref[s] + jnp.dot(h.astype(jnp.bfloat16), w_hh,
                                    preferred_element_type=jnp.float32)
            h_new = jnp.tanh(z)
            if needs_time_mask:
                return jnp.where(s < steps_valid, h_new, h)               # skip padded steps
            return h_new

        h = lax.fori_loop(0, tt, step, h_ref[...], unroll=unroll)
        h_ref[...] = h

        # --- Classifier head (ReLU -> Linear) only after the final time tile. ---
        @pl.when(t == n_t - 1)
        def _():
            h_fin = jnp.maximum(h_ref[...], 0.0)                          # ReLU(h_n)
            out_ref[...] = (jnp.dot(h_fin, w_fc_ref[...],
                                    preferred_element_type=jnp.float32)
                            + b_fc_ref[...])

    return kernel


def rnn_model_forward(tokens, params, *, t_tile=64):
    """tokens: int32 [B, T]. Returns logits f32 [B, 2]."""
    emb_table = params["emb_table"]                 # [V, D] bf16, row 0 is zero (padding_idx)
    D = emb_table.shape[1]
    B, T = tokens.shape

    # Batch tile: multiple of 16 (bf16 sublane packing).  Single tile for small batches
    # (minimizes serial-recurrence passes on 1-TC chips); large batches split into
    # 256-row tiles -> n_b >= 2 so the "parallel" axis can shard across v7x's 2 TCs.
    b_tile = min(B_TILE_CAP, _round_up(B, 16))
    Bp = _round_up(B, b_tile)
    n_b = Bp // b_tile

    # Time tile: keep it large; remainder is handled inside the kernel by masking the
    # trailing steps of the last tile (never by shrinking the tile).
    tt = min(t_tile, T)
    n_t = -(-T // tt)
    Tp = n_t * tt
    unroll = tt if tt <= 16 else 8

    tok = tokens
    if Bp != B or Tp != T:
        tok = jnp.pad(tokens, ((0, Bp - B), (0, Tp - T)))   # pad with padding_idx=0

    # Gather directly into time-major [Tp, Bp, D]; embedding lookup is glue done in XLA.
    emb = emb_table[tok.T]                                  # [Tp, Bp, D] bf16

    kernel = _make_kernel(tt, T, n_t, unroll)

    out = pl.pallas_call(
        kernel,
        out_shape=jax.ShapeDtypeStruct((Bp, OUT_PAD), jnp.float32),
        grid_spec=pltpu.PrefetchScalarGridSpec(
            num_scalar_prefetch=0,
            grid=(n_b, n_t),
            in_specs=[
                pl.BlockSpec((tt, b_tile, D), lambda b, t: (t, b, 0)),      # streamed emb tile
                pl.BlockSpec((D, H_PAD), lambda b, t: (0, 0)),              # W_ih^T (bf16)
                pl.BlockSpec((H_PAD, H_PAD), lambda b, t: (0, 0)),          # W_hh^T (bf16)
                pl.BlockSpec((1, H_PAD), lambda b, t: (0, 0)),              # b_ih + b_hh
                pl.BlockSpec((H_PAD, OUT_PAD), lambda b, t: (0, 0)),        # W_fc^T
                pl.BlockSpec((1, OUT_PAD), lambda b, t: (0, 0)),            # b_fc
            ],
            out_specs=pl.BlockSpec((b_tile, OUT_PAD), lambda b, t: (b, 0)),
            scratch_shapes=[
                pltpu.VMEM((b_tile, H_PAD), jnp.float32),                   # hidden-state carry
                pltpu.VMEM((tt, b_tile, H_PAD), jnp.float32),               # per-tile x_proj
            ],
        ),
        compiler_params=pltpu.CompilerParams(
            dimension_semantics=("parallel", "arbitrary"),
            vmem_limit_bytes=32 * 1024 * 1024),
    )(emb, params["w_ih_t"], params["w_hh_t"], params["bias"],
      params["w_fc_t"], params["b_fc"])

    return out[:B, :2]


def _pad2(x, shape):
    out = jnp.zeros(shape, x.dtype)
    return out.at[:x.shape[0], :x.shape[1]].set(x)


def init_params(key, vocab_size, vector_dim):
    """Deterministic parameter init matching the PyTorch module's shapes (then padded)."""
    D = vector_dim
    H = 2 * vector_dim
    assert H <= H_PAD
    ks = jax.random.split(key, 7)
    s = 1.0 / math.sqrt(H)

    emb_table = jax.random.normal(ks[0], (vocab_size, D), jnp.float32)
    emb_table = emb_table.at[0].set(0.0)                          # padding_idx=0

    w_ih = jax.random.uniform(ks[1], (H, D), jnp.float32, -s, s)  # PyTorch layout [H, D]
    w_hh = jax.random.uniform(ks[2], (H, H), jnp.float32, -s, s)
    b_ih = jax.random.uniform(ks[3], (H,), jnp.float32, -s, s)
    b_hh = jax.random.uniform(ks[4], (H,), jnp.float32, -s, s)
    w_fc = jax.random.uniform(ks[5], (2, H), jnp.float32, -s, s)
    b_fc = jax.random.uniform(ks[6], (2,), jnp.float32, -s, s)

    return {
        # MXU-operand tensors stored bf16 (emb, W_ih, W_hh); carry / bias / tanh / head f32.
        "emb_table": emb_table.astype(jnp.bfloat16),                          # [V, D]
        "w_ih_t": _pad2(w_ih.T, (D, H_PAD)).astype(jnp.bfloat16),             # [D, H_PAD]
        "w_hh_t": _pad2(w_hh.T, (H_PAD, H_PAD)).astype(jnp.bfloat16),         # [H_PAD, H_PAD]
        "bias": _pad2((b_ih + b_hh).reshape(1, H), (1, H_PAD)),               # [1, H_PAD]
        "w_fc_t": _pad2(w_fc.T, (H_PAD, OUT_PAD)),                            # [H_PAD, OUT_PAD]
        "b_fc": _pad2(b_fc.reshape(1, 2), (1, OUT_PAD)),                      # [1, OUT_PAD]
    }


def _reference_forward(tokens, params):
    """Pure-JAX reference mirroring the kernel's numerics (bf16 MXU operands, f32 carry)."""
    emb = params["emb_table"][tokens]                                  # [B, T, D] bf16
    x_proj = jnp.dot(emb, params["w_ih_t"],
                     preferred_element_type=jnp.float32) + params["bias"]   # [B, T, H_PAD]
    w_hh = params["w_hh_t"]                                            # bf16

    def step(h, xp_t):
        h = jnp.tanh(xp_t + jnp.dot(h.astype(jnp.bfloat16), w_hh,
                                    preferred_element_type=jnp.float32))
        return h, None

    h0 = jnp.zeros((tokens.shape[0], H_PAD), jnp.float32)
    h_n, _ = lax.scan(step, h0, jnp.swapaxes(x_proj, 0, 1))            # scan over time
    h_n = jnp.maximum(h_n, 0.0)
    out = jnp.dot(h_n, params["w_fc_t"],
                  preferred_element_type=jnp.float32) + params["b_fc"]
    return out[:, :2]


if __name__ == "__main__":
    key = jax.random.PRNGKey(0)
    k_tok, k_tok2, k_par = jax.random.split(key, 3)

    vector_dim = 16          # D; hidden H = 2*D = 32 (padded to 128 inside the kernel)
    vocab_size = 30
    batch = 2
    seq_len = 8

    params = init_params(k_par, vocab_size, vector_dim)

    # Case 1: T divisible by the time tile (single tile, fully unrolled recurrence).
    tokens = jax.random.randint(k_tok, (batch, seq_len), 0, vocab_size, jnp.int32)
    logits = jax.jit(rnn_model_forward)(tokens, params)
    jax.block_until_ready(logits)
    assert logits.shape == (batch, 2) and logits.dtype == jnp.float32
    ref = _reference_forward(tokens, params)
    assert jnp.allclose(logits, ref, atol=2e-2, rtol=2e-2), (logits, ref)

    # Case 2: T NOT divisible by the time tile -> exercises the in-kernel remainder mask
    # and the hidden-state carry across multiple time tiles.
    tokens2 = jax.random.randint(k_tok2, (batch, 11), 1, vocab_size, jnp.int32)
    logits2 = jax.jit(lambda tok, p: rnn_model_forward(tok, p, t_tile=4))(tokens2, params)
    jax.block_until_ready(logits2)
    ref2 = _reference_forward(tokens2, params)
    assert jnp.allclose(logits2, ref2, atol=2e-2, rtol=2e-2), (logits2, ref2)

    # TODO(synk): the module's self.loss (CrossEntropyLoss) is never used in forward(), so it
    # is intentionally not implemented.
    print("KERNEL_OK")
</pallas_src>

<mosaic_0001>
module attributes {stable_mosaic.version = 11 : i64} {
  func.func @kernel(%arg0: i32, %arg1: i32, %arg2: memref<8x16x16xbf16, #tpu.memory_space<vmem>>, %arg3: memref<16x128xbf16, #tpu.memory_space<vmem>>, %arg4: memref<128x128xbf16, #tpu.memory_space<vmem>>, %arg5: memref<1x128xf32, #tpu.memory_space<vmem>>, %arg6: memref<128x128xf32, #tpu.memory_space<vmem>>, %arg7: memref<1x128xf32, #tpu.memory_space<vmem>>, %arg8: memref<16x128xf32, #tpu.memory_space<vmem>>, %arg9: memref<16x128xf32, #tpu.memory_space<vmem>>, %arg10: memref<8x16x128xf32, #tpu.memory_space<vmem>>) attributes {dimension_semantics = [#tpu.dimension_semantics<parallel>, #tpu.dimension_semantics<arbitrary>], iteration_bounds = array<i64: 1, 1>, scalar_prefetch = 0 : i64, scratch_operands = 2 : i64, tpu.core_type = #tpu.core_type<tc>, window_params = [{transform_indices = @transform_0, window_bounds = array<i64: 8, 16, 16>}, {pipeline_mode = #tpu.pipeline_mode<synchronous>, transform_indices = @transform_1, window_bounds = array<i64: 16, 128>}, {pipeline_mode = #tpu.pipeline_mode<synchronous>, transform_indices = @transform_2, window_bounds = array<i64: 128, 128>}, {pipeline_mode = #tpu.pipeline_mode<synchronous>, transform_indices = @transform_3, window_bounds = array<i64: 1, 128>}, {pipeline_mode = #tpu.pipeline_mode<synchronous>, transform_indices = @transform_4, window_bounds = array<i64: 128, 128>}, {pipeline_mode = #tpu.pipeline_mode<synchronous>, transform_indices = @transform_5, window_bounds = array<i64: 1, 128>}, {transform_indices = @transform_6, window_bounds = array<i64: 16, 128>}]} {
    %c0_i32 = arith.constant 0 : i32
    %0 = arith.cmpi eq, %arg1, %c0_i32 : i32
    %1 = arith.extui %0 : i1 to i32
    %c0_i32_0 = arith.constant 0 : i32
    %2 = arith.cmpi ne, %1, %c0_i32_0 : i32
    scf.if %2 {
      %cst_43 = arith.constant 0.000000e+00 : f32
      %74 = vector.broadcast %cst_43 : f32 to vector<16x128xf32>
      %c0_44 = arith.constant 0 : index
      %c0_45 = arith.constant 0 : index
      %75 = vector.load %arg9[%c0_44, %c0_45] : memref<16x128xf32, #tpu.memory_space<vmem>>, vector<16x128xf32>
      tpu.vector_store %arg9[%c0_44, %c0_45], %74 {strides = array<i32>} : memref<16x128xf32, #tpu.memory_space<vmem>>, vector<16x128xf32>,
    } else {
    }
    %c0 = arith.constant 0 : index
    %c0_1 = arith.constant 0 : index
    %c0_2 = arith.constant 0 : index
    %3 = vector.load %arg2[%c0, %c0_1, %c0_2] : memref<8x16x16xbf16, #tpu.memory_space<vmem>>, vector<8x16x16xbf16>
    %4 = vector.shape_cast %3 : vector<8x16x16xbf16> to vector<128x16xbf16>
    %c0_3 = arith.constant 0 : index
    %c0_4 = arith.constant 0 : index
    %5 = vector.load %arg3[%c0_3, %c0_4] : memref<16x128xbf16, #tpu.memory_space<vmem>>, vector<16x128xbf16>
    %cst = arith.constant dense<0.000000e+00> : vector<128x128xf32>
    %6 = tpu.matmul %4, %5, %cst {dimension_numbers = #tpu.dot_dimension_numbers<[1], [0], [0], [1], [0, 0, 1, 1], [], []>} : vector<128x16xbf16>, vector<16x128xbf16>, vector<128x128xf32> -> vector<128x128xf32>
    %c0_5 = arith.constant 0 : index
    %c0_6 = arith.constant 0 : index
    %7 = vector.load %arg5[%c0_5, %c0_6] : memref<1x128xf32, #tpu.memory_space<vmem>>, vector<1x128xf32>
    %8 = vector.broadcast %7 : vector<1x128xf32> to vector<128x128xf32>
    %9 = arith.addf %6, %8 : vector<128x128xf32>
    %10 = vector.shape_cast %9 : vector<128x128xf32> to vector<8x16x128xf32>
    %c0_7 = arith.constant 0 : index
    %c0_8 = arith.constant 0 : index
    %c0_9 = arith.constant 0 : index
    %11 = vector.load %arg10[%c0_7, %c0_8, %c0_9] : memref<8x16x128xf32, #tpu.memory_space<vmem>>, vector<8x16x128xf32>
    tpu.vector_store %arg10[%c0_7, %c0_8, %c0_9], %10 {strides = array<i32>} : memref<8x16x128xf32, #tpu.memory_space<vmem>>, vector<8x16x128xf32>,
    %c0_10 = arith.constant 0 : index
    %c0_11 = arith.constant 0 : index
    %12 = vector.load %arg4[%c0_10, %c0_11] : memref<128x128xbf16, #tpu.memory_space<vmem>>, vector<128x128xbf16>
    %c0_12 = arith.constant 0 : index
    %c0_13 = arith.constant 0 : index
    %13 = vector.load %arg9[%c0_12, %c0_13] : memref<16x128xf32, #tpu.memory_space<vmem>>, vector<16x128xf32>
    %c0_i32_14 = arith.constant 0 : i32
    %14 = arith.index_cast %c0_i32_14 : i32 to index
    %c0_15 = arith.constant 0 : index
    %c0_16 = arith.constant 0 : index
    %15 = vector.load %arg10[%14, %c0_15, %c0_16] : memref<8x16x128xf32, #tpu.memory_space<vmem>>, vector<1x16x128xf32>
    %16 = vector.shape_cast %15 : vector<1x16x128xf32> to vector<16x128xf32>
    %17 = arith.truncf %13 : vector<16x128xf32> to vector<16x128xbf16>
    %cst_17 = arith.constant dense<0.000000e+00> : vector<16x128xf32>
    %18 = tpu.matmul %17, %12, %cst_17 {dimension_numbers = #tpu.dot_dimension_numbers<[1], [0], [0], [1], [0, 0, 1, 1], [], []>} : vector<16x128xbf16>, vector<128x128xbf16>, vector<16x128xf32> -> vector<16x128xf32>
    %19 = arith.addf %16, %18 : vector<16x128xf32>
    %20 = math.tanh %19 : vector<16x128xf32>
    %c1_i32 = arith.constant 1 : i32
    %21 = arith.index_cast %c1_i32 : i32 to index
    %c0_18 = arith.constant 0 : index
    %c0_19 = arith.constant 0 : index
    %22 = vector.load %arg10[%21, %c0_18, %c0_19] : memref<8x16x128xf32, #tpu.memory_space<vmem>>, vector<1x16x128xf32>
    %23 = vector.shape_cast %22 : vector<1x16x128xf32> to vector<16x128xf32>
    %24 = arith.truncf %20 : vector<16x128xf32> to vector<16x128xbf16>
    %cst_20 = arith.constant dense<0.000000e+00> : vector<16x128xf32>
    %25 = tpu.matmul %24, %12, %cst_20 {dimension_numbers = #tpu.dot_dimension_numbers<[1], [0], [0], [1], [0, 0, 1, 1], [], []>} : vector<16x128xbf16>, vector<128x128xbf16>, vector<16x128xf32> -> vector<16x128xf32>
    %26 = arith.addf %23, %25 : vector<16x128xf32>
    %27 = math.tanh %26 : vector<16x128xf32>
    %c2_i32 = arith.constant 2 : i32
    %28 = arith.index_cast %c2_i32 : i32 to index
    %c0_21 = arith.constant 0 : index
    %c0_22 = arith.constant 0 : index
    %29 = vector.load %arg10[%28, %c0_21, %c0_22] : memref<8x16x128xf32, #tpu.memory_space<vmem>>, vector<1x16x128xf32>
    %30 = vector.shape_cast %29 : vector<1x16x128xf32> to vector<16x128xf32>
    %31 = arith.truncf %27 : vector<16x128xf32> to vector<16x128xbf16>
    %cst_23 = arith.constant dense<0.000000e+00> : vector<16x128xf32>
    %32 = tpu.matmul %31, %12, %cst_23 {dimension_numbers = #tpu.dot_dimension_numbers<[1], [0], [0], [1], [0, 0, 1, 1], [], []>} : vector<16x128xbf16>, vector<128x128xbf16>, vector<16x128xf32> -> vector<16x128xf32>
    %33 = arith.addf %30, %32 : vector<16x128xf32>
    %34 = math.tanh %33 : vector<16x128xf32>
    %c3_i32 = arith.constant 3 : i32
    %35 = arith.index_cast %c3_i32 : i32 to index
    %c0_24 = arith.constant 0 : index
    %c0_25 = arith.constant 0 : index
    %36 = vector.load %arg10[%35, %c0_24, %c0_25] : memref<8x16x128xf32, #tpu.memory_space<vmem>>, vector<1x16x128xf32>
    %37 = vector.shape_cast %36 : vector<1x16x128xf32> to vector<16x128xf32>
    %38 = arith.truncf %34 : vector<16x128xf32> to vector<16x128xbf16>
    %cst_26 = arith.constant dense<0.000000e+00> : vector<16x128xf32>
    %39 = tpu.matmul %38, %12, %cst_26 {dimension_numbers = #tpu.dot_dimension_numbers<[1], [0], [0], [1], [0, 0, 1, 1], [], []>} : vector<16x128xbf16>, vector<128x128xbf16>, vector<16x128xf32> -> vector<16x128xf32>
    %40 = arith.addf %37, %39 : vector<16x128xf32>
    %41 = math.tanh %40 : vector<16x128xf32>
    %c4_i32 = arith.constant 4 : i32
    %42 = arith.index_cast %c4_i32 : i32 to index
    %c0_27 = arith.constant 0 : index
    %c0_28 = arith.constant 0 : index
    %43 = vector.load %arg10[%42, %c0_27, %c0_28] : memref<8x16x128xf32, #tpu.memory_space<vmem>>, vector<1x16x128xf32>
    %44 = vector.shape_cast %43 : vector<1x16x128xf32> to vector<16x128xf32>
    %45 = arith.truncf %41 : vector<16x128xf32> to vector<16x128xbf16>
    %cst_29 = arith.constant dense<0.000000e+00> : vector<16x128xf32>
    %46 = tpu.matmul %45, %12, %cst_29 {dimension_numbers = #tpu.dot_dimension_numbers<[1], [0], [0], [1], [0, 0, 1, 1], [], []>} : vector<16x128xbf16>, vector<128x128xbf16>, vector<16x128xf32> -> vector<16x128xf32>
    %47 = arith.addf %44, %46 : vector<16x128xf32>
    %48 = math.tanh %47 : vector<16x128xf32>
    %c5_i32 = arith.constant 5 : i32
    %49 = arith.index_cast %c5_i32 : i32 to index
    %c0_30 = arith.constant 0 : index
    %c0_31 = arith.constant 0 : index
    %50 = vector.load %arg10[%49, %c0_30, %c0_31] : memref<8x16x128xf32, #tpu.memory_space<vmem>>, vector<1x16x128xf32>
    %51 = vector.shape_cast %50 : vector<1x16x128xf32> to vector<16x128xf32>
    %52 = arith.truncf %48 : vector<16x128xf32> to vector<16x128xbf16>
    %cst_32 = arith.constant dense<0.000000e+00> : vector<16x128xf32>
    %53 = tpu.matmul %52, %12, %cst_32 {dimension_numbers = #tpu.dot_dimension_numbers<[1], [0], [0], [1], [0, 0, 1, 1], [], []>} : vector<16x128xbf16>, vector<128x128xbf16>, vector<16x128xf32> -> vector<16x128xf32>
    %54 = arith.addf %51, %53 : vector<16x128xf32>
    %55 = math.tanh %54 : vector<16x128xf32>
    %c6_i32 = arith.constant 6 : i32
    %56 = arith.index_cast %c6_i32 : i32 to index
    %c0_33 = arith.constant 0 : index
    %c0_34 = arith.constant 0 : index
    %57 = vector.load %arg10[%56, %c0_33, %c0_34] : memref<8x16x128xf32, #tpu.memory_space<vmem>>, vector<1x16x128xf32>
    %58 = vector.shape_cast %57 : vector<1x16x128xf32> to vector<16x128xf32>
    %59 = arith.truncf %55 : vector<16x128xf32> to vector<16x128xbf16>
    %cst_35 = arith.constant dense<0.000000e+00> : vector<16x128xf32>
    %60 = tpu.matmul %59, %12, %cst_35 {dimension_numbers = #tpu.dot_dimension_numbers<[1], [0], [0], [1], [0, 0, 1, 1], [], []>} : vector<16x128xbf16>, vector<128x128xbf16>, vector<16x128xf32> -> vector<16x128xf32>
    %61 = arith.addf %58, %60 : vector<16x128xf32>
    %62 = math.tanh %61 : vector<16x128xf32>
    %c7_i32 = arith.constant 7 : i32
    %63 = arith.index_cast %c7_i32 : i32 to index
    %c0_36 = arith.constant 0 : index
    %c0_37 = arith.constant 0 : index
    %64 = vector.load %arg10[%63, %c0_36, %c0_37] : memref<8x16x128xf32, #tpu.memory_space<vmem>>, vector<1x16x128xf32>
    %65 = vector.shape_cast %64 : vector<1x16x128xf32> to vector<16x128xf32>
    %66 = arith.truncf %62 : vector<16x128xf32> to vector<16x128xbf16>
    %cst_38 = arith.constant dense<0.000000e+00> : vector<16x128xf32>
    %67 = tpu.matmul %66, %12, %cst_38 {dimension_numbers = #tpu.dot_dimension_numbers<[1], [0], [0], [1], [0, 0, 1, 1], [], []>} : vector<16x128xbf16>, vector<128x128xbf16>, vector<16x128xf32> -> vector<16x128xf32>
    %68 = arith.addf %65, %67 : vector<16x128xf32>
    %69 = math.tanh %68 : vector<16x128xf32>
    %c8_i32 = arith.constant 8 : i32
    %c0_39 = arith.constant 0 : index
    %c0_40 = arith.constant 0 : index
    %70 = vector.load %arg9[%c0_39, %c0_40] : memref<16x128xf32, #tpu.memory_space<vmem>>, vector<16x128xf32>
    tpu.vector_store %arg9[%c0_39, %c0_40], %69 {strides = array<i32>} : memref<16x128xf32, #tpu.memory_space<vmem>>, vector<16x128xf32>,
    %c0_i32_41 = arith.constant 0 : i32
    %71 = arith.cmpi eq, %arg1, %c0_i32_41 : i32
    %72 = arith.extui %71 : i1 to i32
    %c0_i32_42 = arith.constant 0 : i32
    %73 = arith.cmpi ne, %72, %c0_i32_42 : i32
    scf.if %73 {
      %c0_43 = arith.constant 0 : index
      %c0_44 = arith.constant 0 : index
      %74 = vector.load %arg9[%c0_43, %c0_44] : memref<16x128xf32, #tpu.memory_space<vmem>>, vector<16x128xf32>
      %cst_45 = arith.constant 0.000000e+00 : f32
      %75 = vector.broadcast %cst_45 : f32 to vector<16x128xf32>
      %76 = arith.maximumf %74, %75 : vector<16x128xf32>
      %c0_46 = arith.constant 0 : index
      %c0_47 = arith.constant 0 : index
      %77 = vector.load %arg6[%c0_46, %c0_47] : memref<128x128xf32, #tpu.memory_space<vmem>>, vector<128x128xf32>
      %cst_48 = arith.constant dense<0.000000e+00> : vector<16x128xf32>
      %78 = tpu.matmul %76, %77, %cst_48 {dimension_numbers = #tpu.dot_dimension_numbers<[1], [0], [0], [1], [0, 0, 1, 1], [], []>} : vector<16x128xf32>, vector<128x128xf32>, vector<16x128xf32> -> vector<16x128xf32>
      %c0_49 = arith.constant 0 : index
      %c0_50 = arith.constant 0 : index
      %79 = vector.load %arg7[%c0_49, %c0_50] : memref<1x128xf32, #tpu.memory_space<vmem>>, vector<1x128xf32>
      %80 = vector.broadcast %79 : vector<1x128xf32> to vector<16x128xf32>
      %81 = arith.addf %78, %80 : vector<16x128xf32>
      %c0_51 = arith.constant 0 : index
      %c0_52 = arith.constant 0 : index
      %82 = vector.load %arg8[%c0_51, %c0_52] : memref<16x128xf32, #tpu.memory_space<vmem>>, vector<16x128xf32>
      tpu.vector_store %arg8[%c0_51, %c0_52], %81 {strides = array<i32>} : memref<16x128xf32, #tpu.memory_space<vmem>>, vector<16x128xf32>,
    } else {
    }
    return
  }
  func.func @transform_0(%arg0: i32, %arg1: i32) -> (i32, i32, i32) {
    %c0_i32 = arith.constant 0 : i32
    %c0_i32_0 = arith.constant 0 : i32
    return %arg1, %arg0, %c0_i32 : i32, i32, i32
  }
  func.func @transform_1(%arg0: i32, %arg1: i32) -> (i32, i32) {
    %c0_i32 = arith.constant 0 : i32
    %c0_i32_0 = arith.constant 0 : i32
    %c0_i32_1 = arith.constant 0 : i32
    return %c0_i32, %c0_i32_0 : i32, i32
  }
  func.func @transform_2(%arg0: i32, %arg1: i32) -> (i32, i32) {
    %c0_i32 = arith.constant 0 : i32
    %c0_i32_0 = arith.constant 0 : i32
    %c0_i32_1 = arith.constant 0 : i32
    return %c0_i32, %c0_i32_0 : i32, i32
  }
  func.func @transform_3(%arg0: i32, %arg1: i32) -> (i32, i32) {
    %c0_i32 = arith.constant 0 : i32
    %c0_i32_0 = arith.constant 0 : i32
    %c0_i32_1 = arith.constant 0 : i32
    return %c0_i32, %c0_i32_0 : i32, i32
  }
  func.func @transform_4(%arg0: i32, %arg1: i32) -> (i32, i32) {
    %c0_i32 = arith.constant 0 : i32
    %c0_i32_0 = arith.constant 0 : i32
    %c0_i32_1 = arith.constant 0 : i32
    return %c0_i32, %c0_i32_0 : i32, i32
  }
  func.func @transform_5(%arg0: i32, %arg1: i32) -> (i32, i32) {
    %c0_i32 = arith.constant 0 : i32
    %c0_i32_0 = arith.constant 0 : i32
    %c0_i32_1 = arith.constant 0 : i32
    return %c0_i32, %c0_i32_0 : i32, i32
  }
  func.func @transform_6(%arg0: i32, %arg1: i32) -> (i32, i32) {
    %c0_i32 = arith.constant 0 : i32
    %c0_i32_0 = arith.constant 0 : i32
    return %arg0, %c0_i32 : i32, i32
  }
}

</mosaic_0001>

<bundles_post_ra>
// kernel: rnn_model_forward.1
= control target key start
LH: loop header
LB: loop body
LE: loop exit
PB: predicated region body
PF: predicated region fallthrough
CT: control target
= control target key end

     0   :  { %v1232_v0 = vmov 0.0   ;;  %vm1233_vm0 = vmmov 0   ;;  %vm101_vm1 = vcmask 130048   ;;  %v1234_v14 = vmov 0.0|0.0   ;;  %s1603_s2 = inlined_call_operand.vmem [shape: bf16[128,128], index: 2, kind: input, shape index: {}]   ;;  %s1604_s1 = inlined_call_operand.vmem [shape: bf16[16,128], index: 1, kind: input, shape index: {}]   ;;  %s1605_s0 = inlined_call_operand.vmem [shape: bf16[8,16,16], index: 0, kind: input, shape index: {}]   ;;  %s1606_s3 = inlined_call_operand.vmem [shape: f32[1,128], index: 3, kind: input, shape index: {}]   ;;  %s1607_s4 = inlined_call_operand.vmem [shape: f32[128,128], index: 4, kind: input, shape index: {}]   ;;  %s1608_s5 = inlined_call_operand.vmem [shape: f32[1,128], index: 5, kind: input, shape index: {}]   ;;  %s1609_s6 = inlined_call_operand.vmem [shape: f32[16,128], index: 6, kind: output, shape index: {}]  }
   0x1   :  { %953 = vmatprep.subr.bf16.mxu1 %v1232_v0  ;;  %v1274_v1 = vld [vmem:[%s1603_s2] sm:$0xff]   ;;  %969 = vmatprep.mubr.msk.bf16.mxu1 %vm1233_vm0, %v1232_v0  ;;  %v1282_v2 = vld [vmem:[%s1603_s2 + $0x8] sm:$0xff]   ;;  %v1288_v3 = vld [vmem:[%s1603_s2 + $0x10] sm:$0xff]  }
   0x2   :  { %954 = vmatpush3.bf16.msra.mxu1 %v1274_v1  ;;  %v1189_v4 = vld [vmem:[%s1604_s1] sm:$0xff]   ;;  %v1192_v6 = vld [vmem:[%s1605_s0 + $0x8] sm:$0xff]   ;;  %v1306_v7 = vld [vmem:[%s1603_s2 + $0x18] sm:$0xff]  }
   0x3   :  { %955 = vmatprep.subr.bf16.mxu1 %v1232_v0  ;;  %v1190_v5 = vld [vmem:[%s1605_s0] sm:$0xff]   ;;  %935 = vmatprep.subr.bf16.mxu0 %v1189_v4  ;;  %v1194_v8 = vld [vmem:[%s1605_s0 + $0x10] sm:$0xff]   ;;  %v1195_v10 = vld [vmem:[%s1605_s0 + $0x18] sm:$0xff]  }
   0x4   :  { %936 = vmatpush3.bf16.msra.mxu0 %v1189_v4  ;;  %937 = vmatprep.mubr.msk.bf16.mxu0 %vm101_vm1, %v1190_v5  ;;  %v1316_v9 = vld [vmem:[%s1603_s2 + $0x20] sm:$0xff]   ;;  %v1332_v11 = vld [vmem:[%s1603_s2 + $0x28] sm:$0xff]   ;;  %v1342_v12 = vld [vmem:[%s1603_s2 + $0x30] sm:$0xff]  }
   0x5   :  { %973 = vmatprep.subr.bf16.mxu0 %v1232_v0  ;;  %v1351_v13 = vld [vmem:[%s1603_s2 + $0x38] sm:$0xff]   ;;  %v1196_v15 = vld [vmem:[%s1605_s0 + $0x20] sm:$0xff]   ;;  %v1197_v16 = vld [vmem:[%s1605_s0 + $0x28] sm:$0xff]  }
   0x6   :  { %956 = vmatpush3.bf16.msra.mxu1 %v1282_v2  ;;  %v1198_v17 = vld [vmem:[%s1605_s0 + $0x30] sm:$0xff]   ;;  %v1199_v18 = vld [vmem:[%s1605_s0 + $0x38] sm:$0xff]   ;;  %v1412_v27 = vld [vmem:[%s1606_s3] ss:$0 sm:$0xff] }
   0x7   :  { %957 = vmatprep.subr.bf16.mxu1 %v1232_v0  ;;  %938 = vmatmul.mubr.msk.bf16.vlgmr.msra.gmra.mrb[0].mxu0 %vm101_vm1, %v1192_v6 }
   0x8   :  { %974 = vmatpush3.bf16.msra.mxu0 %v1274_v1  ;;  %941 = vmatprep.mubr.msk.bf16.mxu0 %vm101_vm1, %v1194_v8 }
   0x9   :  { %975 = vmatprep.subr.bf16.mxu0 %v1232_v0 }
   0xa   :  { %958 = vmatpush3.bf16.msra.mxu1 %v1288_v3 }
   0xb   :  { %959 = vmatprep.subr.bf16.mxu1 %v1232_v0 }
   0xc   :  { %976 = vmatpush3.bf16.msra.mxu0 %v1282_v2 }
   0xd   :  { %977 = vmatprep.subr.bf16.mxu0 %v1232_v0 }
   0xe   :  { %960 = vmatpush3.bf16.msra.mxu1 %v1306_v7 }
   0xf   :  { %961 = vmatprep.subr.bf16.mxu1 %v1232_v0  ;;  %942 = vmatmul.mubr.msk.bf16.gmra.mrb[4].mxu0 %vm101_vm1, %v1195_v10 }
  0x10   :  { %978 = vmatpush3.bf16.msra.mxu0 %v1288_v3  ;;  %945 = vmatprep.mubr.msk.bf16.mxu0 %vm101_vm1, %v1196_v15 }
  0x11   :  { %979 = vmatprep.subr.bf16.mxu0 %v1232_v0 }
  0x12   :  { %962 = vmatpush3.bf16.msra.mxu1 %v1316_v9 }
  0x13   :  { %963 = vmatprep.subr.bf16.mxu1 %v1232_v0 }
  0x14   :  { %980 = vmatpush3.bf16.msra.mxu0 %v1306_v7 }
  0x15   :  { %981 = vmatprep.subr.bf16.mxu0 %v1232_v0 }
  0x16   :  { %964 = vmatpush3.bf16.msra.mxu1 %v1332_v11 }
  0x17   :  { %965 = vmatprep.subr.bf16.mxu1 %v1232_v0  ;;  %946 = vmatmul.mubr.msk.bf16.gmra.mrb[8].mxu0 %vm101_vm1, %v1197_v16 }
  0x18   :  { %982 = vmatpush3.bf16.msra.mxu0 %v1316_v9  ;;  %949 = vmatprep.mubr.msk.bf16.mxu0 %vm101_vm1, %v1198_v17 }
  0x19   :  { %983 = vmatprep.subr.bf16.mxu0 %v1232_v0 }
  0x1a   :  { %966 = vmatpush3.bf16.msra.mxu1 %v1342_v12 }
  0x1b   :  { %967 = vmatprep.subr.bf16.mxu1 %v1232_v0 }
  0x1c   :  { %984 = vmatpush3.bf16.msra.mxu0 %v1332_v11 }
  0x1d   :  { %985 = vmatprep.subr.bf16.mxu0 %v1232_v0 }
  0x1e   :  { %968 = vmatpush3.bf16.msra.mxu1 %v1351_v13 }
  0x1f   :  { %993 = vmatprep.subr.bf16.mxu1 %v1232_v0  ;;  %950 = vmatmul.mubr.msk.bf16.gmra.mrb[12].mxu0 %vm101_vm1, %v1199_v18 }
  0x20   :  { %986 = vmatpush3.bf16.msra.mxu0 %v1342_v12  ;;  %989 = vmatprep.mubr.msk.bf16.mxu0 %vm1233_vm0, %v1232_v0 }
  0x21   :  { %970 = vmatmul.mubr.bf16.vlgmr.msra.gmra.mrb[0].mxu1 %v1234_v14  ;;  %987 = vmatprep.subr.bf16.mxu0 %v1232_v0 }
  0x22   :  { %994 = vmatpush3.bf16.msra.mxu1 %v1274_v1  ;;  %1009 = vmatprep.mubr.msk.bf16.mxu1 %vm1233_vm0, %v1232_v0 }
  0x23   :  { %995 = vmatprep.subr.bf16.mxu1 %v1232_v0 }
  0x24   :  { %988 = vmatpush3.bf16.msra.mxu0 %v1351_v13 }
  0x25   :  { %1013 = vmatprep.subr.bf16.mxu0 %v1232_v0 }
  0x26   :  { %996 = vmatpush3.bf16.msra.mxu1 %v1282_v2 }
  0x27   :  { %997 = vmatprep.subr.bf16.mxu1 %v1232_v0 }
  0x2a   :  { %998 = vmatpush3.bf16.msra.mxu1 %v1288_v3 }
  0x2b   :  { %999 = vmatprep.subr.bf16.mxu1 %v1232_v0 }
  0x2e   :  { %1000 = vmatpush3.bf16.msra.mxu1 %v1306_v7 }
  0x2f   :  { %1001 = vmatprep.subr.bf16.mxu1 %v1232_v0 }
  0x32   :  { %1002 = vmatpush3.bf16.msra.mxu1 %v1316_v9 }
  0x33   :  { %1003 = vmatprep.subr.bf16.mxu1 %v1232_v0 }
  0x36   :  { %1004 = vmatpush3.bf16.msra.mxu1 %v1332_v11 }
  0x37   :  { %1005 = vmatprep.subr.bf16.mxu1 %v1232_v0 }
  0x3a   :  { %1006 = vmatpush3.bf16.msra.mxu1 %v1342_v12 }
  0x3b   :  { %1007 = vmatprep.subr.bf16.mxu1 %v1232_v0 }
  0x3e   :  { %1008 = vmatpush3.bf16.msra.mxu1 %v1351_v13 }
  0x3f   :  { %1033 = vmatprep.subr.bf16.mxu1 %v1232_v0 }
  0xda   :  { %v939_v19 = vpop.f32.mrb[0].mxu0 }
  0xdb   :  { %v160_v20 = vpop.f32.mrb[1].mxu0  ;;  %v169_v47 = vadd.f32 %v939_v19, %v1412_v27 }
  0xdc   :  { %v940_v21 = vpop.f32.mrb[2].mxu0  ;;  %v161_v28 = vadd.f32 %v1412_v27, %v160_v20 }
  0xdd   :  { %v163_v22 = vpop.f32.mrb[3].mxu0  ;;  %v172_v49 = vadd.f32 %v940_v21, %v1412_v27 }
  0xde   :  { %v164_v30 = vadd.f32 %v1412_v27, %v163_v22 }
  0xe2   :  { %v1401_v23 = vpop.f32.mrb[4].mxu0 }
  0xe3   :  { %v1403_v24 = vpop.f32.mrb[5].mxu0  ;;  %v185_v14 = vadd.f32 %v1401_v23, %v1412_v27 }
  0xe4   :  { %v1405_v25 = vpop.f32.mrb[6].mxu0  ;;  %v177_v58 = vadd.f32 %v1412_v27, %v1403_v24 }
  0xe5   :  { %v1407_v26 = vpop.f32.mrb[7].mxu0  ;;  %v188_v16 = vadd.f32 %v1405_v25, %v1412_v27 }
  0xe6   :  { %v180_v60 = vadd.f32 %v1412_v27, %v1407_v26 }
  0xea   :  { %v1434_v39 = vpop.f32.mrb[8].mxu0 }
  0xeb   :  { %v1436_v40 = vpop.f32.mrb[9].mxu0 }
  0xec   :  { %v1438_v41 = vpop.f32.mrb[10].mxu0  ;;  %v193_v23 = vadd.f32 %v1412_v27, %v1436_v40 }
  0xed   :  { %v1440_v42 = vpop.f32.mrb[11].mxu0 }
  0xf2   :  { %v1442_v43 = vpop.f32.mrb[12].mxu0 }
  0xf3   :  { %v1444_v44 = vpop.f32.mrb[13].mxu0 }
  0xf4   :  { %v342_v29 = vpop.f32.mrb[0].mxu1  ;;  %v1446_v45 = vpop.f32.mrb[14].mxu0 }
  0xf5   :  { %v349_v31 = vadd.f32 %v342_v29, %v161_v28  ;;  %v971_v32 = vpop.f32.mrb[1].mxu1  ;;  %v1448_v46 = vpop.f32.mrb[15].mxu0  ;;  %v196_v28 = vadd.f32 %v1412_v27, %v1440_v42 }
  0xf6   :  { %v345_v33 = vpop.f32.mrb[2].mxu1 }
  0xf7   :  { %v350_v34 = vadd.f32 %v345_v33, %v164_v30  ;;  %v972_v35 = vpop.f32.mrb[3].mxu1  ;;  %1200 = vtanh.f32 %v349_v31 }
  0xf9   :  { %1202 = vtanh.f32 %v350_v34 }
 0x101   :  { %v1201_v36 = vpop.eup %1200 }
 0x103   :  { %v1203_v37 = vpop.eup %1202 }
 0x104   :  { %v356_v38 = vpack.c.bf16 %v1203_v37, %v1201_v36 }
 0x106   :  { %990 = vmatmul.mubr.bf16.vlgmr.msra.gmra.mrb[16].mxu0 %v356_v38 }
 0x107   :  { %1014 = vmatpush3.bf16.msra.mxu0 %v1274_v1  ;;  %1029 = vmatprep.mubr.msk.bf16.mxu0 %vm1233_vm0, %v1232_v0 }
 0x108   :  { %1015 = vmatprep.subr.bf16.mxu0 %v1232_v0 }
 0x10b   :  { %1016 = vmatpush3.bf16.msra.mxu0 %v1282_v2 }
 0x10c   :  { %1017 = vmatprep.subr.bf16.mxu0 %v1232_v0 }
 0x10f   :  { %1018 = vmatpush3.bf16.msra.mxu0 %v1288_v3 }
 0x110   :  { %1019 = vmatprep.subr.bf16.mxu0 %v1232_v0 }
 0x113   :  { %1020 = vmatpush3.bf16.msra.mxu0 %v1306_v7 }
 0x114   :  { %1021 = vmatprep.subr.bf16.mxu0 %v1232_v0 }
 0x117   :  { %1022 = vmatpush3.bf16.msra.mxu0 %v1316_v9 }
 0x118   :  { %1023 = vmatprep.subr.bf16.mxu0 %v1232_v0 }
 0x11b   :  { %1024 = vmatpush3.bf16.msra.mxu0 %v1332_v11 }
 0x11c   :  { %1025 = vmatprep.subr.bf16.mxu0 %v1232_v0 }
 0x11f   :  { %1026 = vmatpush3.bf16.msra.mxu0 %v1342_v12 }
 0x120   :  { %1027 = vmatprep.subr.bf16.mxu0 %v1232_v0 }
 0x123   :  { %1028 = vmatpush3.bf16.msra.mxu0 %v1351_v13 }
 0x124   :  { %1053 = vmatprep.subr.bf16.mxu0 %v1232_v0 }
 0x1d9   :  { %v391_v48 = vpop.f32.mrb[16].mxu0 }
 0x1da   :  { %v398_v50 = vadd.f32 %v391_v48, %v169_v47  ;;  %v991_v51 = vpop.f32.mrb[17].mxu0  ;;  %v708_v47 = vld [vmem:[%s1607_s4 + $0x18] sm:$0xff] }
 0x1db   :  { %v394_v52 = vpop.f32.mrb[18].mxu0 }
 0x1dc   :  { %v399_v53 = vadd.f32 %v394_v52, %v172_v49  ;;  %v992_v54 = vpop.f32.mrb[19].mxu0  ;;  %1204 = vtanh.f32 %v398_v50  ;;  %v709_v49 = vld [vmem:[%s1607_s4 + $0x20] sm:$0xff]  ;;  %v710_v50 = vld [vmem:[%s1607_s4 + $0x28] sm:$0xff]  ;;  %v711_v52 = vld [vmem:[%s1607_s4 + $0x30] sm:$0xff] }
 0x1dd   :  { %v1156_v51 = vpack.c.bf16 %v710_v50, %v709_v49 }
 0x1de   :  { %1206 = vtanh.f32 %v399_v53  ;;  %v712_v53 = vld [vmem:[%s1607_s4 + $0x38] sm:$0xff] }
 0x1df   :  { %v1160_v54 = vpack.c.bf16 %v712_v53, %v711_v52 }
 0x1e6   :  { %v1205_v55 = vpop.eup %1204 }
 0x1e8   :  { %v1207_v56 = vpop.eup %1206 }
 0x1e9   :  { %v405_v57 = vpack.c.bf16 %v1207_v56, %v1205_v55  ;;  %v209_v55 = vadd.f32 %v1412_v27, %v1444_v44  ;;  %v714_v44 = vld [vmem:[%s1607_s4 + $0x48] sm:$0xff] }
 0x1eb   :  { %1010 = vmatmul.mubr.bf16.vlgmr.msra.gmra.mrb[4].mxu1 %v405_v57  ;;  %v212_v57 = vadd.f32 %v1412_v27, %v1448_v46 }
 0x1ec   :  { %1034 = vmatpush3.bf16.msra.mxu1 %v1274_v1  ;;  %1049 = vmatprep.mubr.msk.bf16.mxu1 %vm1233_vm0, %v1232_v0 }
 0x1ed   :  { %1035 = vmatprep.subr.bf16.mxu1 %v1232_v0 }
 0x1f0   :  { %1036 = vmatpush3.bf16.msra.mxu1 %v1282_v2 }
 0x1f1   :  { %1037 = vmatprep.subr.bf16.mxu1 %v1232_v0 }
 0x1f4   :  { %1038 = vmatpush3.bf16.msra.mxu1 %v1288_v3 }
 0x1f5   :  { %1039 = vmatprep.subr.bf16.mxu1 %v1232_v0 }
 0x1f8   :  { %1040 = vmatpush3.bf16.msra.mxu1 %v1306_v7 }
 0x1f9   :  { %1041 = vmatprep.subr.bf16.mxu1 %v1232_v0 }
 0x1fc   :  { %1042 = vmatpush3.bf16.msra.mxu1 %v1316_v9 }
 0x1fd   :  { %1043 = vmatprep.subr.bf16.mxu1 %v1232_v0 }
 0x200   :  { %1044 = vmatpush3.bf16.msra.mxu1 %v1332_v11 }
 0x201   :  { %1045 = vmatprep.subr.bf16.mxu1 %v1232_v0 }
 0x204   :  { %1046 = vmatpush3.bf16.msra.mxu1 %v1342_v12 }
 0x205   :  { %1047 = vmatprep.subr.bf16.mxu1 %v1232_v0 }
 0x208   :  { %1048 = vmatpush3.bf16.msra.mxu1 %v1351_v13 }
 0x209   :  { %1073 = vmatprep.subr.bf16.mxu1 %v1232_v0 }
 0x2be   :  { %v440_v59 = vpop.f32.mrb[4].mxu1 }
 0x2bf   :  { %v447_v61 = vadd.f32 %v440_v59, %v177_v58  ;;  %v1011_v62 = vpop.f32.mrb[5].mxu1 }
 0x2c0   :  { %v443_v63 = vpop.f32.mrb[6].mxu1 }
 0x2c1   :  { %v448_v4 = vadd.f32 %v443_v63, %v180_v60  ;;  %v1012_v5 = vpop.f32.mrb[7].mxu1  ;;  %1208 = vtanh.f32 %v447_v61 }
 0x2c3   :  { %1210 = vtanh.f32 %v448_v4 }
 0x2cb   :  { %v1209_v6 = vpop.eup %1208 }
 0x2cd   :  { %v1211_v8 = vpop.eup %1210 }
 0x2ce   :  { %v454_v10 = vpack.c.bf16 %v1211_v8, %v1209_v6  ;;  %v713_v6 = vld [vmem:[%s1607_s4 + $0x40] sm:$0xff]  ;;  %v715_v8 = vld [vmem:[%s1607_s4 + $0x50] sm:$0xff] }
 0x2cf   :  { %v1164_v46 = vpack.c.bf16 %v714_v44, %v713_v6 }
 0x2d0   :  { %1030 = vmatmul.mubr.bf16.vlgmr.msra.gmra.mrb[20].mxu0 %v454_v10  ;;  %v716_v10 = vld [vmem:[%s1607_s4 + $0x58] sm:$0xff] }
 0x2d1   :  { %1054 = vmatpush3.bf16.msra.mxu0 %v1274_v1  ;;  %1069 = vmatprep.mubr.msk.bf16.mxu0 %vm1233_vm0, %v1232_v0 }
 0x2d2   :  { %1055 = vmatprep.subr.bf16.mxu0 %v1232_v0 }
 0x2d5   :  { %1056 = vmatpush3.bf16.msra.mxu0 %v1282_v2 }
 0x2d6   :  { %1057 = vmatprep.subr.bf16.mxu0 %v1232_v0 }
 0x2d9   :  { %1058 = vmatpush3.bf16.msra.mxu0 %v1288_v3 }
 0x2da   :  { %1059 = vmatprep.subr.bf16.mxu0 %v1232_v0 }
 0x2dd   :  { %1060 = vmatpush3.bf16.msra.mxu0 %v1306_v7 }
 0x2de   :  { %1061 = vmatprep.subr.bf16.mxu0 %v1232_v0 }
 0x2e1   :  { %1062 = vmatpush3.bf16.msra.mxu0 %v1316_v9 }
 0x2e2   :  { %1063 = vmatprep.subr.bf16.mxu0 %v1232_v0 }
 0x2e5   :  { %1064 = vmatpush3.bf16.msra.mxu0 %v1332_v11 }
 0x2e6   :  { %1065 = vmatprep.subr.bf16.mxu0 %v1232_v0 }
 0x2e9   :  { %1066 = vmatpush3.bf16.msra.mxu0 %v1342_v12 }
 0x2ea   :  { %1067 = vmatprep.subr.bf16.mxu0 %v1232_v0 }
 0x2ed   :  { %1068 = vmatpush3.bf16.msra.mxu0 %v1351_v13 }
 0x2ee   :  { %1093 = vmatprep.subr.bf16.mxu0 %v1232_v0 }
 0x3a3   :  { %v489_v15 = vpop.f32.mrb[20].mxu0 }
 0x3a4   :  { %v496_v17 = vadd.f32 %v489_v15, %v185_v14  ;;  %v1031_v18 = vpop.f32.mrb[21].mxu0  ;;  %v1168_v14 = vpack.c.bf16 %v716_v10, %v715_v8  ;;  %v717_v15 = vld [vmem:[%s1607_s4 + $0x60] sm:$0xff] }
 0x3a5   :  { %v492_v19 = vpop.f32.mrb[22].mxu0  ;;  %v719_v18 = vld [vmem:[%s1607_s4 + $0x70] sm:$0xff] }
 0x3a6   :  { %v497_v20 = vadd.f32 %v492_v19, %v188_v16  ;;  %v1032_v21 = vpop.f32.mrb[23].mxu0  ;;  %1212 = vtanh.f32 %v496_v17  ;;  %v718_v16 = vld [vmem:[%s1607_s4 + $0x68] sm:$0xff]  ;;  %v720_v19 = vld [vmem:[%s1607_s4 + $0x78] sm:$0xff] }
 0x3a7   :  { %v1172_v17 = vpack.c.bf16 %v718_v16, %v717_v15  ;;  %v217_v21 = vadd.f32 %v1442_v43, %v1412_v27  ;;  %v835_v43 = vld [vmem:[%s1608_s5] ss:$0 sm:$0xff] }
 0x3a8   :  { %1214 = vtanh.f32 %v497_v20  ;;  %v1176_v20 = vpack.c.bf16 %v720_v19, %v719_v18 }
 0x3b0   :  { %v1213_v22 = vpop.eup %1212 }
 0x3b2   :  { %v1215_v24 = vpop.eup %1214 }
 0x3b3   :  { %v503_v26 = vpack.c.bf16 %v1215_v24, %v1213_v22  ;;  %v220_v24 = vadd.f32 %v1446_v45, %v1412_v27 }
 0x3b5   :  { %1050 = vmatmul.mubr.bf16.vlgmr.msra.gmra.mrb[8].mxu1 %v503_v26 }
 0x3b6   :  { %1074 = vmatpush3.bf16.msra.mxu1 %v1274_v1  ;;  %1089 = vmatprep.mubr.msk.bf16.mxu1 %vm1233_vm0, %v1232_v0 }
 0x3b7   :  { %1075 = vmatprep.subr.bf16.mxu1 %v1232_v0 }
 0x3ba   :  { %1076 = vmatpush3.bf16.msra.mxu1 %v1282_v2 }
 0x3bb   :  { %1077 = vmatprep.subr.bf16.mxu1 %v1232_v0 }
 0x3be   :  { %1078 = vmatpush3.bf16.msra.mxu1 %v1288_v3 }
 0x3bf   :  { %1079 = vmatprep.subr.bf16.mxu1 %v1232_v0 }
 0x3c2   :  { %1080 = vmatpush3.bf16.msra.mxu1 %v1306_v7 }
 0x3c3   :  { %1081 = vmatprep.subr.bf16.mxu1 %v1232_v0 }
 0x3c6   :  { %1082 = vmatpush3.bf16.msra.mxu1 %v1316_v9 }
 0x3c7   :  { %1083 = vmatprep.subr.bf16.mxu1 %v1232_v0 }
 0x3ca   :  { %1084 = vmatpush3.bf16.msra.mxu1 %v1332_v11 }
 0x3cb   :  { %1085 = vmatprep.subr.bf16.mxu1 %v1232_v0 }
 0x3ce   :  { %1086 = vmatpush3.bf16.msra.mxu1 %v1342_v12 }
 0x3cf   :  { %1087 = vmatprep.subr.bf16.mxu1 %v1232_v0 }
 0x3d2   :  { %1088 = vmatpush3.bf16.msra.mxu1 %v1351_v13 }
 0x488   :  { %v538_v25 = vpop.f32.mrb[8].mxu1 }
 0x489   :  { %v545_v29 = vadd.f32 %v538_v25, %v193_v23  ;;  %v1051_v30 = vpop.f32.mrb[9].mxu1 }
 0x48a   :  { %v541_v31 = vpop.f32.mrb[10].mxu1 }
 0x48b   :  { %v546_v32 = vadd.f32 %v541_v31, %v196_v28  ;;  %v1052_v33 = vpop.f32.mrb[11].mxu1  ;;  %1216 = vtanh.f32 %v545_v29 }
 0x48d   :  { %1218 = vtanh.f32 %v546_v32 }
 0x495   :  { %v1217_v34 = vpop.eup %1216 }
 0x497   :  { %v1219_v35 = vpop.eup %1218 }
 0x498   :  { %v552_v36 = vpack.c.bf16 %v1219_v35, %v1217_v34 }
 0x49a   :  { %1070 = vmatmul.mubr.bf16.vlgmr.msra.gmra.mrb[24].mxu0 %v552_v36 }
 0x49b   :  { %1094 = vmatpush3.bf16.msra.mxu0 %v1274_v1  ;;  %1109 = vmatprep.mubr.msk.bf16.mxu0 %vm1233_vm0, %v1232_v0  ;;  %v201_v1 = vadd.f32 %v1434_v39, %v1412_v27  ;;  %v707_v39 = vld [vmem:[%s1607_s4 + $0x10] sm:$0xff] }
 0x49c   :  { %1095 = vmatprep.subr.bf16.mxu0 %v1232_v0  ;;  %v1152_v48 = vpack.c.bf16 %v708_v47, %v707_v39 }
 0x49f   :  { %1096 = vmatpush3.bf16.msra.mxu0 %v1282_v2 }
 0x4a0   :  { %1097 = vmatprep.subr.bf16.mxu0 %v1232_v0 }
 0x4a3   :  { %1098 = vmatpush3.bf16.msra.mxu0 %v1288_v3  ;;  %v204_v3 = vadd.f32 %v1438_v41, %v1412_v27 }
 0x4a4   :  { %1099 = vmatprep.subr.bf16.mxu0 %v1232_v0 }
 0x4a7   :  { %1100 = vmatpush3.bf16.msra.mxu0 %v1306_v7 }
 0x4a8   :  { %1101 = vmatprep.subr.bf16.mxu0 %v1232_v0 }
 0x4ab   :  { %1102 = vmatpush3.bf16.msra.mxu0 %v1316_v9 }
 0x4ac   :  { %1103 = vmatprep.subr.bf16.mxu0 %v1232_v0 }
 0x4af   :  { %1104 = vmatpush3.bf16.msra.mxu0 %v1332_v11 }
 0x4b0   :  { %1105 = vmatprep.subr.bf16.mxu0 %v1232_v0 }
 0x4b3   :  { %1106 = vmatpush3.bf16.msra.mxu0 %v1342_v12 }
 0x4b4   :  { %1107 = vmatprep.subr.bf16.mxu0 %v1232_v0  ;;  %v705_v0 = vld [vmem:[%s1607_s4] sm:$0xff] }
 0x4b7   :  { %1108 = vmatpush3.bf16.msra.mxu0 %v1351_v13  ;;  %v706_v13 = vld [vmem:[%s1607_s4 + $0x8] sm:$0xff] }
 0x4b8   :  { %v1148_v41 = vpack.c.bf16 %v706_v13, %v705_v0 }
 0x4ba   :  { %1149 = vmatprep.subr.bf16.mxu1 %v1148_v41 }
 0x56d   :  { %v587_v2 = vpop.f32.mrb[24].mxu0 }
 0x56e   :  { %v594_v7 = vadd.f32 %v587_v2, %v201_v1  ;;  %v1071_v9 = vpop.f32.mrb[25].mxu0 }
 0x56f   :  { %v590_v37 = vpop.f32.mrb[26].mxu0 }
 0x570   :  { %v595_v38 = vadd.f32 %v590_v37, %v204_v3  ;;  %v1072_v11 = vpop.f32.mrb[27].mxu0  ;;  %1220 = vtanh.f32 %v594_v7 }
 0x572   :  { %1222 = vtanh.f32 %v595_v38 }
 0x57a   :  { %v1221_v40 = vpop.eup %1220 }
 0x57c   :  { %v1223_v12 = vpop.eup %1222 }
 0x57d   :  { %v601_v42 = vpack.c.bf16 %v1223_v12, %v1221_v40 }
 0x57f   :  { %1090 = vmatmul.mubr.bf16.vlgmr.msra.gmra.mrb[12].mxu1 %v601_v42 }
 0x580   :  { %1151 = vmatpush3.bf16.msra.mxu1 %v1148_v41 }
 0x581   :  { %1153 = vmatprep.subr.bf16.mxu1 %v1152_v48 }
 0x584   :  { %1155 = vmatpush3.bf16.msra.mxu1 %v1152_v48 }
 0x585   :  { %1157 = vmatprep.subr.bf16.mxu1 %v1156_v51 }
 0x588   :  { %1159 = vmatpush3.bf16.msra.mxu1 %v1156_v51 }
 0x589   :  { %1161 = vmatprep.subr.bf16.mxu1 %v1160_v54 }
 0x58c   :  { %1163 = vmatpush3.bf16.msra.mxu1 %v1160_v54 }
 0x58d   :  { %1165 = vmatprep.subr.bf16.mxu1 %v1164_v46 }
 0x590   :  { %1167 = vmatpush3.bf16.msra.mxu1 %v1164_v46 }
 0x591   :  { %1169 = vmatprep.subr.bf16.mxu1 %v1168_v14 }
 0x594   :  { %1171 = vmatpush3.bf16.msra.mxu1 %v1168_v14 }
 0x595   :  { %1173 = vmatprep.subr.bf16.mxu1 %v1172_v17 }
 0x598   :  { %1175 = vmatpush3.bf16.msra.mxu1 %v1172_v17 }
 0x599   :  { %1177 = vmatprep.subr.bf16.mxu1 %v1176_v20 }
 0x59c   :  { %1179 = vmatpush3.bf16.msra.mxu1 %v1176_v20 }
 0x652   :  { %v636_v56 = vpop.f32.mrb[12].mxu1 }
 0x653   :  { %v643_v58 = vadd.f32 %v636_v56, %v209_v55  ;;  %v1091_v59 = vpop.f32.mrb[13].mxu1 }
 0x654   :  { %v639_v60 = vpop.f32.mrb[14].mxu1 }
 0x655   :  { %v644_v61 = vadd.f32 %v639_v60, %v212_v57  ;;  %v1092_v62 = vpop.f32.mrb[15].mxu1  ;;  %1224 = vtanh.f32 %v643_v58 }
 0x657   :  { %1226 = vtanh.f32 %v644_v61 }
 0x65f   :  { %v1225_v63 = vpop.eup %1224 }
 0x661   :  { %v1227_v4 = vpop.eup %1226 }
 0x662   :  { %v650_v5 = vpack.c.bf16 %v1227_v4, %v1225_v63 }
 0x664   :  { %1110 = vmatmul.mubr.bf16.vlgmr.msra.gmra.mrb[28].mxu0 %v650_v5 }
 0x737   :  { %v685_v22 = vpop.f32.mrb[28].mxu0 }
 0x738   :  { %v692_v26 = vadd.f32 %v685_v22, %v217_v21  ;;  %v1111_v23 = vpop.f32.mrb[29].mxu0 }
 0x739   :  { %v688_v25 = vpop.f32.mrb[30].mxu0 }
 0x73a   :  { %1228 = vtanh.f32 %v692_v26  ;;  %v693_v28 = vadd.f32 %v688_v25, %v220_v24  ;;  %v1112_v29 = vpop.f32.mrb[31].mxu0 }
 0x73c   :  { %1230 = vtanh.f32 %v693_v28 }
 0x744   :  { %v1229_v30 = vpop.eup %1228 }
 0x745   :  { %v703_v31 = vmax.f32 %v1229_v30, 0.0 }
 0x746   :  { %v1231_v32 = vpop.eup %1230 }
 0x747   :  { %v704_v33 = vmax.f32 %v1231_v32, 0.0  ;;  %1145 = vmatprep.mubr.f32.mxu1 %v703_v31 }
 0x749   :  { %1146 = vmatmul.mubr.f32.vlgmr.msra.gmra.mrb[16].mxu1 %v704_v33 }
 0x81c   :  { %v1147_v34 = vpop.f32.mrb[16].mxu1 }
 0x81d   :  { %v800_v35 = vadd.f32 %v1147_v34, %v835_v43  ;;  %v794_v27 = vpop.f32.mrb[17].mxu1 }
 0x81e   :  { %v795_v45 = vadd.f32 %v835_v43, %v794_v27 }
 0x81f   :  { %804 = vst [vmem:[%s1609_s6 + $0x8] sm:$0xff] %v800_v35 }
 0x820   :  { %803 = vst [vmem:[%s1609_s6] sm:$0xff] %v795_v45 }

</bundles_post_ra>
